<compile_context>
chip_gen: v7x
topology: tpu7x:2x2x1
jax: 0.10.0
libtpu: 0.0.40
codegen_flags: <defaults>
</compile_context>

<pallas_src>
import jax
import jax.numpy as jnp
from jax.experimental import pallas as pl
from jax.experimental.pallas import tpu as pltpu

EMBEDDING_LENGTH = 27  # 26 letters + space


def rnn1_kernel(word_ref, w_aa_ref, w_ax_ref, b_a_ref, w_y_ref, b_y_ref,
                out_ref, xproj_ref, a_all_ref):
    """Whole-sequence RNN forward for one batch tile.

    word_ref : [Tx, bt, E]        input letters (time-major, batch-padded)
    w_aa     : [hidden, hidden]   W_a[:, :hidden].T   (recurrent part)
    w_ax     : [E, hidden]        W_a[:, hidden:].T   (input part)
    b_a      : [1, hidden]
    w_y      : [hidden, E]        W_y.T
    b_y      : [1, E]
    out_ref  : [Tx, bt, E]
    xproj_ref: [Tx, bt, hidden]   VMEM scratch (hoisted input projection)
    a_all_ref: [Tx, bt, hidden]   VMEM scratch (all hidden states)
    """
    Tx, bt, E = word_ref.shape
    hidden = w_aa_ref.shape[1]
    mxu_dtype = w_aa_ref.dtype

    # Hoisted loop-invariant loads / broadcasts.
    w_aa = w_aa_ref[...]
    w_ax = w_ax_ref[...]
    w_y = w_y_ref[...]
    b_a_b = jnp.broadcast_to(b_a_ref[...].astype(jnp.float32), (bt, hidden))
    b_y_b = jnp.broadcast_to(b_y_ref[...].astype(jnp.float32), (Tx * bt, E))

    # ---- Stage 1: hoisted input projection (one big MXU pass) -------------
    word2d = word_ref[...].reshape(Tx * bt, E).astype(mxu_dtype)
    proj2d = jnp.dot(word2d, w_ax, preferred_element_type=jnp.float32)
    xproj_ref[...] = proj2d.reshape(Tx, bt, hidden)

    # ---- Stage 2: serial recurrence (single small matmul per step) --------
    # t = 0: a = 0, x = 0  ->  next_a = tanh(b_a)
    a1 = jnp.tanh(b_a_b)
    a_all_ref[0] = a1

    def step(t, a):
        pre = (jnp.dot(a.astype(mxu_dtype), w_aa,
                       preferred_element_type=jnp.float32)
               + xproj_ref[t - 1] + b_a_b)           # x_t = word[t-1]
        nxt = jnp.tanh(pre)
        a_all_ref[t] = nxt
        return nxt

    # Short static trip count -> full unroll; cap unroll for long sequences.
    unroll = True if Tx <= 32 else 8
    jax.lax.fori_loop(1, Tx, step, a1, unroll=unroll)

    # ---- Stage 3: deferred output projection + single bulk store ----------
    a2d = a_all_ref[...].reshape(Tx * bt, hidden).astype(mxu_dtype)
    y2d = jnp.dot(a2d, w_y, preferred_element_type=jnp.float32) + b_y_b
    out_ref[...] = y2d.reshape(Tx, bt, E).astype(out_ref.dtype)


def rnn1_forward(word_btE, params, *, mxu_dtype=jnp.float32, batch_tile=None):
    """word_btE: [batch, Tx, EMBEDDING_LENGTH] -> [batch, Tx, EMBEDDING_LENGTH].

    mxu_dtype : dtype for MXU operands (jnp.bfloat16 recommended on v6e/v7x;
                tanh / bias math always stays f32, so v5e-safe).
    batch_tile: batch block per grid step (multiple of 8); for large batch on
                v7x pick batch_p // 2 so both TensorCores get work.
    """
    W_a, b_a, W_y, b_y = params["W_a"], params["b_a"], params["W_y"], params["b_y"]
    hidden = W_a.shape[0]
    E = EMBEDDING_LENGTH
    batch, Tx, _ = word_btE.shape

    # PyTorch Linear computes z @ W.T + b; cat((a, x), 1) means the first
    # `hidden` columns of W_a act on a and the last E columns act on x.
    W_aa = jnp.transpose(W_a[:, :hidden]).astype(mxu_dtype)   # [hidden, hidden]
    W_ax = jnp.transpose(W_a[:, hidden:]).astype(mxu_dtype)   # [E, hidden]
    W_yT = jnp.transpose(W_y).astype(mxu_dtype)               # [hidden, E]
    b_a2 = b_a.reshape(1, hidden).astype(jnp.float32)
    b_y2 = b_y.reshape(1, E).astype(jnp.float32)

    # Time-major + sublane-aligned batch padding.
    batch_p = ((batch + 7) // 8) * 8
    word_tbE = jnp.transpose(word_btE, (1, 0, 2)).astype(mxu_dtype)
    if batch_p != batch:
        word_tbE = jnp.pad(word_tbE, ((0, 0), (0, batch_p - batch), (0, 0)))

    if batch_tile is None:
        batch_tile = batch_p
    assert batch_tile % 8 == 0 and batch_p % batch_tile == 0
    grid = (batch_p // batch_tile,)

    out_tbE = pl.pallas_call(
        rnn1_kernel,
        out_shape=jax.ShapeDtypeStruct((Tx, batch_p, E), jnp.float32),
        grid_spec=pltpu.PrefetchScalarGridSpec(
            num_scalar_prefetch=0,
            grid=grid,
            in_specs=[
                pl.BlockSpec((Tx, batch_tile, E), lambda b: (0, b, 0)),   # word
                pl.BlockSpec((hidden, hidden), lambda b: (0, 0)),         # W_aa
                pl.BlockSpec((E, hidden), lambda b: (0, 0)),              # W_ax
                pl.BlockSpec((1, hidden), lambda b: (0, 0)),              # b_a
                pl.BlockSpec((hidden, E), lambda b: (0, 0)),              # W_y^T
                pl.BlockSpec((1, E), lambda b: (0, 0)),                   # b_y
            ],
            out_specs=pl.BlockSpec((Tx, batch_tile, E), lambda b: (0, b, 0)),
            scratch_shapes=[
                pltpu.VMEM((Tx, batch_tile, hidden), jnp.float32),  # xproj
                pltpu.VMEM((Tx, batch_tile, hidden), jnp.float32),  # a_all
            ]),
        compiler_params=pltpu.CompilerParams(
            dimension_semantics=("parallel",)),
    )(word_tbE, W_aa, W_ax, b_a2, W_yT, b_y2)

    out_tbE = out_tbE[:, :batch, :]                 # drop batch padding
    return jnp.transpose(out_tbE, (1, 0, 2))        # back to [batch, Tx, E]


def rnn1_reference(word_btE, params):
    """Pure-JAX reference matching the PyTorch forward, for verification."""
    W_a, b_a, W_y, b_y = params["W_a"], params["b_a"], params["W_y"], params["b_y"]
    hidden = W_a.shape[0]
    batch, Tx, E = word_btE.shape
    word_tbE = jnp.transpose(word_btE, (1, 0, 2)).astype(jnp.float32)

    def step(carry, w_t):
        a, x = carry
        cat = jnp.concatenate([a, x], axis=1)
        next_a = jnp.tanh(cat @ W_a.T + b_a)
        hat_y = next_a @ W_y.T + b_y
        return (next_a, w_t), hat_y

    a0 = jnp.zeros((batch, hidden), jnp.float32)
    x0 = jnp.zeros((batch, E), jnp.float32)
    _, ys = jax.lax.scan(step, (a0, x0), word_tbE)
    return jnp.transpose(ys, (1, 0, 2))


def init_params(key, hidden_units):
    """Deterministic init mimicking nn.Linear default (uniform +-1/sqrt(fan_in))."""
    E = EMBEDDING_LENGTH
    k1, k2, k3, k4 = jax.random.split(key, 4)
    fan_a = hidden_units + E
    bound_a = 1.0 / jnp.sqrt(fan_a)
    bound_y = 1.0 / jnp.sqrt(hidden_units)
    return {
        "W_a": jax.random.uniform(k1, (hidden_units, fan_a), jnp.float32, -bound_a, bound_a),
        "b_a": jax.random.uniform(k2, (hidden_units,), jnp.float32, -bound_a, bound_a),
        "W_y": jax.random.uniform(k3, (E, hidden_units), jnp.float32, -bound_y, bound_y),
        "b_y": jax.random.uniform(k4, (E,), jnp.float32, -bound_y, bound_y),
    }


if __name__ == "__main__":
    key = jax.random.PRNGKey(0)
    kp, kx = jax.random.split(key)

    hidden_units = 64       # module default
    batch, Tx = 2, 8

    params = init_params(kp, hidden_units)

    # One-hot word tensor [batch, Tx, EMBEDDING_LENGTH]
    idx = jax.random.randint(kx, (batch, Tx), 0, EMBEDDING_LENGTH)
    word = jax.nn.one_hot(idx, EMBEDDING_LENGTH, dtype=jnp.float32)

    ref = rnn1_reference(word, params)

    # f32 MXU path (exact vs reference).
    out = jax.block_until_ready(rnn1_forward(word, params))
    assert out.shape == (batch, Tx, EMBEDDING_LENGTH)
    assert jnp.allclose(out, ref, atol=1e-5, rtol=1e-5), "f32 mismatch vs reference"

    # bf16 MXU-operand path (v6e/v7x fast path; tanh/bias still f32).
    out_bf16 = jax.block_until_ready(
        rnn1_forward(word, params, mxu_dtype=jnp.bfloat16))
    assert jnp.allclose(out_bf16, ref, atol=5e-2, rtol=5e-2), "bf16 mismatch vs reference"

    print("KERNEL_OK")
</pallas_src>

<mosaic_0001>
module attributes {stable_mosaic.version = 11 : i64} {
  func.func @rnn1_kernel(%arg0: i32, %arg1: memref<8x8x27xf32, #tpu.memory_space<vmem>>, %arg2: memref<64x64xf32, #tpu.memory_space<vmem>>, %arg3: memref<27x64xf32, #tpu.memory_space<vmem>>, %arg4: memref<1x64xf32, #tpu.memory_space<vmem>>, %arg5: memref<64x27xf32, #tpu.memory_space<vmem>>, %arg6: memref<1x27xf32, #tpu.memory_space<vmem>>, %arg7: memref<8x8x27xf32, #tpu.memory_space<vmem>>, %arg8: memref<8x8x64xf32, #tpu.memory_space<vmem>>, %arg9: memref<8x8x64xf32, #tpu.memory_space<vmem>>) attributes {dimension_semantics = [#tpu.dimension_semantics<parallel>], iteration_bounds = array<i64: 1>, scalar_prefetch = 0 : i64, scratch_operands = 2 : i64, tpu.core_type = #tpu.core_type<tc>, window_params = [{transform_indices = @transform_0, window_bounds = array<i64: 8, 8, 27>}, {pipeline_mode = #tpu.pipeline_mode<synchronous>, transform_indices = @transform_1, window_bounds = array<i64: 64, 64>}, {pipeline_mode = #tpu.pipeline_mode<synchronous>, transform_indices = @transform_2, window_bounds = array<i64: 27, 64>}, {pipeline_mode = #tpu.pipeline_mode<synchronous>, transform_indices = @transform_3, window_bounds = array<i64: 1, 64>}, {pipeline_mode = #tpu.pipeline_mode<synchronous>, transform_indices = @transform_4, window_bounds = array<i64: 64, 27>}, {pipeline_mode = #tpu.pipeline_mode<synchronous>, transform_indices = @transform_5, window_bounds = array<i64: 1, 27>}, {transform_indices = @transform_6, window_bounds = array<i64: 8, 8, 27>}]} {
    %c0 = arith.constant 0 : index
    %c0_0 = arith.constant 0 : index
    %0 = vector.load %arg2[%c0, %c0_0] : memref<64x64xf32, #tpu.memory_space<vmem>>, vector<64x64xf32>
    %c0_1 = arith.constant 0 : index
    %c0_2 = arith.constant 0 : index
    %1 = vector.load %arg3[%c0_1, %c0_2] : memref<27x64xf32, #tpu.memory_space<vmem>>, vector<27x64xf32>
    %c0_3 = arith.constant 0 : index
    %c0_4 = arith.constant 0 : index
    %2 = vector.load %arg5[%c0_3, %c0_4] : memref<64x27xf32, #tpu.memory_space<vmem>>, vector<64x27xf32>
    %c0_5 = arith.constant 0 : index
    %c0_6 = arith.constant 0 : index
    %3 = vector.load %arg4[%c0_5, %c0_6] : memref<1x64xf32, #tpu.memory_space<vmem>>, vector<1x64xf32>
    %4 = vector.shape_cast %3 : vector<1x64xf32> to vector<1x64xf32>
    %5 = vector.broadcast %4 : vector<1x64xf32> to vector<8x64xf32>
    %c0_7 = arith.constant 0 : index
    %c0_8 = arith.constant 0 : index
    %6 = vector.load %arg6[%c0_7, %c0_8] : memref<1x27xf32, #tpu.memory_space<vmem>>, vector<1x27xf32>
    %7 = vector.shape_cast %6 : vector<1x27xf32> to vector<1x27xf32>
    %8 = vector.broadcast %7 : vector<1x27xf32> to vector<64x27xf32>
    %c0_9 = arith.constant 0 : index
    %c0_10 = arith.constant 0 : index
    %c0_11 = arith.constant 0 : index
    %9 = vector.load %arg1[%c0_9, %c0_10, %c0_11] : memref<8x8x27xf32, #tpu.memory_space<vmem>>, vector<8x8x27xf32>
    %10 = vector.shape_cast %9 : vector<8x8x27xf32> to vector<64x27xf32>
    %cst = arith.constant dense<0.000000e+00> : vector<64x64xf32>
    %11 = tpu.matmul %10, %1, %cst {dimension_numbers = #tpu.dot_dimension_numbers<[1], [0], [0], [1], [0, 0, 1, 1], [], []>} : vector<64x27xf32>, vector<27x64xf32>, vector<64x64xf32> -> vector<64x64xf32>
    %12 = vector.shape_cast %11 : vector<64x64xf32> to vector<8x8x64xf32>
    %c0_12 = arith.constant 0 : index
    %c0_13 = arith.constant 0 : index
    %c0_14 = arith.constant 0 : index
    %13 = vector.load %arg8[%c0_12, %c0_13, %c0_14] : memref<8x8x64xf32, #tpu.memory_space<vmem>>, vector<8x8x64xf32>
    tpu.vector_store %arg8[%c0_12, %c0_13, %c0_14], %12 {strides = array<i32>} : memref<8x8x64xf32, #tpu.memory_space<vmem>>, vector<8x8x64xf32>,
    %14 = math.tanh %5 : vector<8x64xf32>
    %c0_15 = arith.constant 0 : index
    %c0_16 = arith.constant 0 : index
    %c0_17 = arith.constant 0 : index
    %15 = vector.load %arg9[%c0_15, %c0_16, %c0_17] : memref<8x8x64xf32, #tpu.memory_space<vmem>>, vector<1x8x64xf32>
    %16 = vector.shape_cast %15 : vector<1x8x64xf32> to vector<8x64xf32>
    %17 = vector.shape_cast %14 : vector<8x64xf32> to vector<1x8x64xf32>
    tpu.vector_store %arg9[%c0_15, %c0_16, %c0_17], %17 {strides = array<i32>} : memref<8x8x64xf32, #tpu.memory_space<vmem>>, vector<1x8x64xf32>,
    %c1_i32 = arith.constant 1 : i32
    %cst_18 = arith.constant dense<0.000000e+00> : vector<8x64xf32>
    %18 = tpu.matmul %14, %0, %cst_18 {dimension_numbers = #tpu.dot_dimension_numbers<[1], [0], [0], [1], [0, 0, 1, 1], [], []>} : vector<8x64xf32>, vector<64x64xf32>, vector<8x64xf32> -> vector<8x64xf32>
    %c1_i32_19 = arith.constant 1 : i32
    %19 = arith.subi %c1_i32, %c1_i32_19 : i32
    %20 = arith.index_cast %19 : i32 to index
    %c0_20 = arith.constant 0 : index
    %c0_21 = arith.constant 0 : index
    %21 = vector.load %arg8[%20, %c0_20, %c0_21] : memref<8x8x64xf32, #tpu.memory_space<vmem>>, vector<1x8x64xf32>
    %22 = vector.shape_cast %21 : vector<1x8x64xf32> to vector<8x64xf32>
    %23 = arith.addf %18, %22 : vector<8x64xf32>
    %24 = arith.addf %23, %5 : vector<8x64xf32>
    %25 = math.tanh %24 : vector<8x64xf32>
    %26 = arith.index_cast %c1_i32 : i32 to index
    %c0_22 = arith.constant 0 : index
    %c0_23 = arith.constant 0 : index
    %27 = vector.load %arg9[%26, %c0_22, %c0_23] : memref<8x8x64xf32, #tpu.memory_space<vmem>>, vector<1x8x64xf32>
    %28 = vector.shape_cast %27 : vector<1x8x64xf32> to vector<8x64xf32>
    %29 = vector.shape_cast %25 : vector<8x64xf32> to vector<1x8x64xf32>
    tpu.vector_store %arg9[%26, %c0_22, %c0_23], %29 {strides = array<i32>} : memref<8x8x64xf32, #tpu.memory_space<vmem>>, vector<1x8x64xf32>,
    %c2_i32 = arith.constant 2 : i32
    %cst_24 = arith.constant dense<0.000000e+00> : vector<8x64xf32>
    %30 = tpu.matmul %25, %0, %cst_24 {dimension_numbers = #tpu.dot_dimension_numbers<[1], [0], [0], [1], [0, 0, 1, 1], [], []>} : vector<8x64xf32>, vector<64x64xf32>, vector<8x64xf32> -> vector<8x64xf32>
    %c1_i32_25 = arith.constant 1 : i32
    %31 = arith.subi %c2_i32, %c1_i32_25 : i32
    %32 = arith.index_cast %31 : i32 to index
    %c0_26 = arith.constant 0 : index
    %c0_27 = arith.constant 0 : index
    %33 = vector.load %arg8[%32, %c0_26, %c0_27] : memref<8x8x64xf32, #tpu.memory_space<vmem>>, vector<1x8x64xf32>
    %34 = vector.shape_cast %33 : vector<1x8x64xf32> to vector<8x64xf32>
    %35 = arith.addf %30, %34 : vector<8x64xf32>
    %36 = arith.addf %35, %5 : vector<8x64xf32>
    %37 = math.tanh %36 : vector<8x64xf32>
    %38 = arith.index_cast %c2_i32 : i32 to index
    %c0_28 = arith.constant 0 : index
    %c0_29 = arith.constant 0 : index
    %39 = vector.load %arg9[%38, %c0_28, %c0_29] : memref<8x8x64xf32, #tpu.memory_space<vmem>>, vector<1x8x64xf32>
    %40 = vector.shape_cast %39 : vector<1x8x64xf32> to vector<8x64xf32>
    %41 = vector.shape_cast %37 : vector<8x64xf32> to vector<1x8x64xf32>
    tpu.vector_store %arg9[%38, %c0_28, %c0_29], %41 {strides = array<i32>} : memref<8x8x64xf32, #tpu.memory_space<vmem>>, vector<1x8x64xf32>,
    %c3_i32 = arith.constant 3 : i32
    %cst_30 = arith.constant dense<0.000000e+00> : vector<8x64xf32>
    %42 = tpu.matmul %37, %0, %cst_30 {dimension_numbers = #tpu.dot_dimension_numbers<[1], [0], [0], [1], [0, 0, 1, 1], [], []>} : vector<8x64xf32>, vector<64x64xf32>, vector<8x64xf32> -> vector<8x64xf32>
    %c1_i32_31 = arith.constant 1 : i32
    %43 = arith.subi %c3_i32, %c1_i32_31 : i32
    %44 = arith.index_cast %43 : i32 to index
    %c0_32 = arith.constant 0 : index
    %c0_33 = arith.constant 0 : index
    %45 = vector.load %arg8[%44, %c0_32, %c0_33] : memref<8x8x64xf32, #tpu.memory_space<vmem>>, vector<1x8x64xf32>
    %46 = vector.shape_cast %45 : vector<1x8x64xf32> to vector<8x64xf32>
    %47 = arith.addf %42, %46 : vector<8x64xf32>
    %48 = arith.addf %47, %5 : vector<8x64xf32>
    %49 = math.tanh %48 : vector<8x64xf32>
    %50 = arith.index_cast %c3_i32 : i32 to index
    %c0_34 = arith.constant 0 : index
    %c0_35 = arith.constant 0 : index
    %51 = vector.load %arg9[%50, %c0_34, %c0_35] : memref<8x8x64xf32, #tpu.memory_space<vmem>>, vector<1x8x64xf32>
    %52 = vector.shape_cast %51 : vector<1x8x64xf32> to vector<8x64xf32>
    %53 = vector.shape_cast %49 : vector<8x64xf32> to vector<1x8x64xf32>
    tpu.vector_store %arg9[%50, %c0_34, %c0_35], %53 {strides = array<i32>} : memref<8x8x64xf32, #tpu.memory_space<vmem>>, vector<1x8x64xf32>,
    %c4_i32 = arith.constant 4 : i32
    %cst_36 = arith.constant dense<0.000000e+00> : vector<8x64xf32>
    %54 = tpu.matmul %49, %0, %cst_36 {dimension_numbers = #tpu.dot_dimension_numbers<[1], [0], [0], [1], [0, 0, 1, 1], [], []>} : vector<8x64xf32>, vector<64x64xf32>, vector<8x64xf32> -> vector<8x64xf32>
    %c1_i32_37 = arith.constant 1 : i32
    %55 = arith.subi %c4_i32, %c1_i32_37 : i32
    %56 = arith.index_cast %55 : i32 to index
    %c0_38 = arith.constant 0 : index
    %c0_39 = arith.constant 0 : index
    %57 = vector.load %arg8[%56, %c0_38, %c0_39] : memref<8x8x64xf32, #tpu.memory_space<vmem>>, vector<1x8x64xf32>
    %58 = vector.shape_cast %57 : vector<1x8x64xf32> to vector<8x64xf32>
    %59 = arith.addf %54, %58 : vector<8x64xf32>
    %60 = arith.addf %59, %5 : vector<8x64xf32>
    %61 = math.tanh %60 : vector<8x64xf32>
    %62 = arith.index_cast %c4_i32 : i32 to index
    %c0_40 = arith.constant 0 : index
    %c0_41 = arith.constant 0 : index
    %63 = vector.load %arg9[%62, %c0_40, %c0_41] : memref<8x8x64xf32, #tpu.memory_space<vmem>>, vector<1x8x64xf32>
    %64 = vector.shape_cast %63 : vector<1x8x64xf32> to vector<8x64xf32>
    %65 = vector.shape_cast %61 : vector<8x64xf32> to vector<1x8x64xf32>
    tpu.vector_store %arg9[%62, %c0_40, %c0_41], %65 {strides = array<i32>} : memref<8x8x64xf32, #tpu.memory_space<vmem>>, vector<1x8x64xf32>,
    %c5_i32 = arith.constant 5 : i32
    %cst_42 = arith.constant dense<0.000000e+00> : vector<8x64xf32>
    %66 = tpu.matmul %61, %0, %cst_42 {dimension_numbers = #tpu.dot_dimension_numbers<[1], [0], [0], [1], [0, 0, 1, 1], [], []>} : vector<8x64xf32>, vector<64x64xf32>, vector<8x64xf32> -> vector<8x64xf32>
    %c1_i32_43 = arith.constant 1 : i32
    %67 = arith.subi %c5_i32, %c1_i32_43 : i32
    %68 = arith.index_cast %67 : i32 to index
    %c0_44 = arith.constant 0 : index
    %c0_45 = arith.constant 0 : index
    %69 = vector.load %arg8[%68, %c0_44, %c0_45] : memref<8x8x64xf32, #tpu.memory_space<vmem>>, vector<1x8x64xf32>
    %70 = vector.shape_cast %69 : vector<1x8x64xf32> to vector<8x64xf32>
    %71 = arith.addf %66, %70 : vector<8x64xf32>
    %72 = arith.addf %71, %5 : vector<8x64xf32>
    %73 = math.tanh %72 : vector<8x64xf32>
    %74 = arith.index_cast %c5_i32 : i32 to index
    %c0_46 = arith.constant 0 : index
    %c0_47 = arith.constant 0 : index
    %75 = vector.load %arg9[%74, %c0_46, %c0_47] : memref<8x8x64xf32, #tpu.memory_space<vmem>>, vector<1x8x64xf32>
    %76 = vector.shape_cast %75 : vector<1x8x64xf32> to vector<8x64xf32>
    %77 = vector.shape_cast %73 : vector<8x64xf32> to vector<1x8x64xf32>
    tpu.vector_store %arg9[%74, %c0_46, %c0_47], %77 {strides = array<i32>} : memref<8x8x64xf32, #tpu.memory_space<vmem>>, vector<1x8x64xf32>,
    %c6_i32 = arith.constant 6 : i32
    %cst_48 = arith.constant dense<0.000000e+00> : vector<8x64xf32>
    %78 = tpu.matmul %73, %0, %cst_48 {dimension_numbers = #tpu.dot_dimension_numbers<[1], [0], [0], [1], [0, 0, 1, 1], [], []>} : vector<8x64xf32>, vector<64x64xf32>, vector<8x64xf32> -> vector<8x64xf32>
    %c1_i32_49 = arith.constant 1 : i32
    %79 = arith.subi %c6_i32, %c1_i32_49 : i32
    %80 = arith.index_cast %79 : i32 to index
    %c0_50 = arith.constant 0 : index
    %c0_51 = arith.constant 0 : index
    %81 = vector.load %arg8[%80, %c0_50, %c0_51] : memref<8x8x64xf32, #tpu.memory_space<vmem>>, vector<1x8x64xf32>
    %82 = vector.shape_cast %81 : vector<1x8x64xf32> to vector<8x64xf32>
    %83 = arith.addf %78, %82 : vector<8x64xf32>
    %84 = arith.addf %83, %5 : vector<8x64xf32>
    %85 = math.tanh %84 : vector<8x64xf32>
    %86 = arith.index_cast %c6_i32 : i32 to index
    %c0_52 = arith.constant 0 : index
    %c0_53 = arith.constant 0 : index
    %87 = vector.load %arg9[%86, %c0_52, %c0_53] : memref<8x8x64xf32, #tpu.memory_space<vmem>>, vector<1x8x64xf32>
    %88 = vector.shape_cast %87 : vector<1x8x64xf32> to vector<8x64xf32>
    %89 = vector.shape_cast %85 : vector<8x64xf32> to vector<1x8x64xf32>
    tpu.vector_store %arg9[%86, %c0_52, %c0_53], %89 {strides = array<i32>} : memref<8x8x64xf32, #tpu.memory_space<vmem>>, vector<1x8x64xf32>,
    %c7_i32 = arith.constant 7 : i32
    %cst_54 = arith.constant dense<0.000000e+00> : vector<8x64xf32>
    %90 = tpu.matmul %85, %0, %cst_54 {dimension_numbers = #tpu.dot_dimension_numbers<[1], [0], [0], [1], [0, 0, 1, 1], [], []>} : vector<8x64xf32>, vector<64x64xf32>, vector<8x64xf32> -> vector<8x64xf32>
    %c1_i32_55 = arith.constant 1 : i32
    %91 = arith.subi %c7_i32, %c1_i32_55 : i32
    %92 = arith.index_cast %91 : i32 to index
    %c0_56 = arith.constant 0 : index
    %c0_57 = arith.constant 0 : index
    %93 = vector.load %arg8[%92, %c0_56, %c0_57] : memref<8x8x64xf32, #tpu.memory_space<vmem>>, vector<1x8x64xf32>
    %94 = vector.shape_cast %93 : vector<1x8x64xf32> to vector<8x64xf32>
    %95 = arith.addf %90, %94 : vector<8x64xf32>
    %96 = arith.addf %95, %5 : vector<8x64xf32>
    %97 = math.tanh %96 : vector<8x64xf32>
    %98 = arith.index_cast %c7_i32 : i32 to index
    %c0_58 = arith.constant 0 : index
    %c0_59 = arith.constant 0 : index
    %99 = vector.load %arg9[%98, %c0_58, %c0_59] : memref<8x8x64xf32, #tpu.memory_space<vmem>>, vector<1x8x64xf32>
    %100 = vector.shape_cast %99 : vector<1x8x64xf32> to vector<8x64xf32>
    %101 = vector.shape_cast %97 : vector<8x64xf32> to vector<1x8x64xf32>
    tpu.vector_store %arg9[%98, %c0_58, %c0_59], %101 {strides = array<i32>} : memref<8x8x64xf32, #tpu.memory_space<vmem>>, vector<1x8x64xf32>,
    %c7_i32_60 = arith.constant 7 : i32
    %c0_61 = arith.constant 0 : index
    %c0_62 = arith.constant 0 : index
    %c0_63 = arith.constant 0 : index
    %102 = vector.load %arg9[%c0_61, %c0_62, %c0_63] : memref<8x8x64xf32, #tpu.memory_space<vmem>>, vector<8x8x64xf32>
    %103 = vector.shape_cast %102 : vector<8x8x64xf32> to vector<64x64xf32>
    %cst_64 = arith.constant dense<0.000000e+00> : vector<64x27xf32>
    %104 = tpu.matmul %103, %2, %cst_64 {dimension_numbers = #tpu.dot_dimension_numbers<[1], [0], [0], [1], [0, 0, 1, 1], [], []>} : vector<64x64xf32>, vector<64x27xf32>, vector<64x27xf32> -> vector<64x27xf32>
    %105 = arith.addf %104, %8 : vector<64x27xf32>
    %106 = vector.shape_cast %105 : vector<64x27xf32> to vector<8x8x27xf32>
    %c0_65 = arith.constant 0 : index
    %c0_66 = arith.constant 0 : index
    %c0_67 = arith.constant 0 : index
    %107 = vector.load %arg7[%c0_65, %c0_66, %c0_67] : memref<8x8x27xf32, #tpu.memory_space<vmem>>, vector<8x8x27xf32>
    tpu.vector_store %arg7[%c0_65, %c0_66, %c0_67], %106 {strides = array<i32>} : memref<8x8x27xf32, #tpu.memory_space<vmem>>, vector<8x8x27xf32>,
    return
  }
  func.func @transform_0(%arg0: i32) -> (i32, i32, i32) {
    %c0_i32 = arith.constant 0 : i32
    %c0_i32_0 = arith.constant 0 : i32
    %c0_i32_1 = arith.constant 0 : i32
    return %c0_i32, %arg0, %c0_i32_0 : i32, i32, i32
  }
  func.func @transform_1(%arg0: i32) -> (i32, i32) {
    %c0_i32 = arith.constant 0 : i32
    %c0_i32_0 = arith.constant 0 : i32
    %c0_i32_1 = arith.constant 0 : i32
    return %c0_i32, %c0_i32_0 : i32, i32
  }
  func.func @transform_2(%arg0: i32) -> (i32, i32) {
    %c0_i32 = arith.constant 0 : i32
    %c0_i32_0 = arith.constant 0 : i32
    %c0_i32_1 = arith.constant 0 : i32
    return %c0_i32, %c0_i32_0 : i32, i32
  }
  func.func @transform_3(%arg0: i32) -> (i32, i32) {
    %c0_i32 = arith.constant 0 : i32
    %c0_i32_0 = arith.constant 0 : i32
    %c0_i32_1 = arith.constant 0 : i32
    return %c0_i32, %c0_i32_0 : i32, i32
  }
  func.func @transform_4(%arg0: i32) -> (i32, i32) {
    %c0_i32 = arith.constant 0 : i32
    %c0_i32_0 = arith.constant 0 : i32
    %c0_i32_1 = arith.constant 0 : i32
    return %c0_i32, %c0_i32_0 : i32, i32
  }
  func.func @transform_5(%arg0: i32) -> (i32, i32) {
    %c0_i32 = arith.constant 0 : i32
    %c0_i32_0 = arith.constant 0 : i32
    %c0_i32_1 = arith.constant 0 : i32
    return %c0_i32, %c0_i32_0 : i32, i32
  }
  func.func @transform_6(%arg0: i32) -> (i32, i32, i32) {
    %c0_i32 = arith.constant 0 : i32
    %c0_i32_0 = arith.constant 0 : i32
    %c0_i32_1 = arith.constant 0 : i32
    return %c0_i32, %arg0, %c0_i32_0 : i32, i32, i32
  }
}

</mosaic_0001>

<bundles_post_ra>
// kernel: tpu_custom_call.1
= control target key start
LH: loop header
LB: loop body
LE: loop exit
PB: predicated region body
PF: predicated region fallthrough
CT: control target
= control target key end

     0   :  { %11 = vsyncpa [#allocation5], 0  ;;  %s1692_s0 = inlined_call_operand.vmem [shape: f32[8,8,27], index: 0, kind: input, shape index: {}]   ;;  %s1693_s1 = inlined_call_operand.hbm [shape: f32[64,64], index: 1, kind: input, shape index: {}]   ;;  %s1694_s2 = inlined_call_operand.vmem [shape: f32[27,64], index: 2, kind: input, shape index: {}]   ;;  %s1695_s3 = inlined_call_operand.vmem [shape: f32[1,64], index: 3, kind: input, shape index: {}]   ;;  %s1696_s4 = inlined_call_operand.vmem [shape: f32[64,27], index: 4, kind: input, shape index: {}]   ;;  %s1697_s5 = inlined_call_operand.vmem [shape: f32[1,27], index: 5, kind: input, shape index: {}]   ;;  %s1698_s6 = inlined_call_operand.hbm [shape: f32[8,8,27], index: 6, kind: output, shape index: {}]  }
   0x1   :  { %12 = vsyncpa [#allocation6], 0  ;;  %s1419_s21 = smov [#allocation4]   ;;  %s1371_s25 = scalar_lea.hbm %s1693_s1, 1024 }
   0x2   :  { %s20_s22 = sshll.u32 %s1419_s21, 4  ;;  %p1372_p0 = scmp.ne.s32.totalorder %s1693_s1, %s1371_s25  ;;  %s21_s22 = int_to_ptr.vmem [resolvable:$true] %s20_s22 }
   0x3   :  { %p1375_p1 = scmp.lt.u32.totalorder %s1371_s25, %s1693_s1 }
   0x5   :  { %p1377_p2 = pnand %p1375_p1, %p1372_p0 }
   0x7   :  { %1380 = shalt.err (!%p1377_p2)
}
   0x8   :  { %s1381_s30 = scalar_lea.vmem %s21_s22, 1024  ;;  %p1386_p4 = scmp.lt.s32.totalorder %s21_s22, %s21_s22 }
   0x9   :  { %p1382_p3 = scmp.ne.s32.totalorder %s21_s22, %s1381_s30  ;;  %p1387_p5 = scmp.lt.s32.totalorder %s1381_s30, %s1381_s30 }
   0xb   :  { %p1388_p6 = por %p1387_p5, %p1386_p4 }
   0xd   :  { %p1389_p7 = pnand %p1388_p6, %p1382_p3 }
   0xf   :  { %1392 = shalt.err (!%p1389_p7)
}
  0x10   :  { %s1420_s7 = smov 128   ;;  %s1421_s8 = smov 8  }
  0x11   :  { %26 = dma.hbm_to_vmem [thread:$0]  %s1693_s1, 1024, %s21_s22, [#allocation5], %s1420_s7, %s1420_s7, %s1421_s8  }
  0x12   :  { %1415 = dma.done.wait [#allocation5], 1024  }
  0x13   :  { %1416 = vsyncadd [#allocation5], 4294966272  ;;  %v1422_v0 = vmov 0.0|0.0   ;;  %vm1423_vm0 = vmmov 0   ;;  %v1424_v1 = vmov 0.0   ;;  %vm105_vm1 = vcmask 1042432  }
  0x14   :  { %1259 = vmatprep.subr.bf16.mxu0 %v1422_v0  ;;  %1111 = vmatprep.mubr.msk.f32.mxu0 %vm1423_vm0, %v1424_v1  ;;  %vm80_vm2 = vcmask 220160   ;;  %v46_v2 = vld [vmem:[%s1694_s2] sm:$0xff]  ;;  %v47_v3 = vld [vmem:[%s1694_s2 + $0x8] sm:$0xff]  ;;  %v48_v4 = vld [vmem:[%s1694_s2 + $0x10] sm:$0xff]  ;;  %vm1425_vm3 = vmmov 1   ;;  %vm214_vm5 = vcmask 523264  }
  0x15   :  { %v1237_v5 = vpack.c.bf16 %v47_v3, %v46_v2  ;;  %v49_v6 = vld [vmem:[%s1694_s2 + $0x18] sm:$0x7]  ;;  %v72_v7 = vld [vmem:[%s1692_s0] sm:$0xff]  ;;  %vm1242_vm4 = vmpackc.low %vm105_vm1, %vm1425_vm3 }
  0x16   :  { %v1241_v8 = vpack.c.bf16 %v49_v6, %v48_v4  ;;  %1064 = vmatprep.mubr.msk.f32.mxu1 %vm80_vm2, %v72_v7  ;;  %v38_v9 = vld [vmem:[#allocation4] sm:$0xff]  ;;  %v39_v10 = vld [vmem:[#allocation4 + $0x8] sm:$0xff]  ;;  %v40_v12 = vld [vmem:[#allocation4 + $0x10] sm:$0xff] }
  0x17   :  { %1238 = vmatprep.subr.bf16.mxu1 %v1237_v5  ;;  %v1496_v11 = vpack.c.bf16 %v39_v10, %v38_v9  ;;  %v41_v13 = vld [vmem:[#allocation4 + $0x18] sm:$0xff]  ;;  %v1502_v14 = vld [vmem:[%s1695_s3] ss:$0 sm:$0xff]  ;;  %v73_v16 = vld [vmem:[%s1692_s0 + $0x8] sm:$0xff] }
  0x18   :  { %1240 = vmatpush3.bf16.msra.mxu1 %v1237_v5  ;;  %v1505_v15 = vpack.c.bf16 %v41_v13, %v40_v12  ;;  %1355 = vtanh.f32 %v1502_v14  ;;  %v42_v17 = vld [vmem:[#allocation4 + $0x20] sm:$0xff]  ;;  %v43_v18 = vld [vmem:[#allocation4 + $0x28] sm:$0xff]  ;;  %v74_v19 = vld [vmem:[%s1692_s0 + $0x10] sm:$0xff] }
  0x19   :  { %1243 = vmatprep.subr.msk.bf16.mxu1 %vm1242_vm4, %v1241_v8  ;;  %1261 = vmatpush3.bf16.msra.mxu0 %v1496_v11  ;;  %v1518_v20 = vpack.c.bf16 %v43_v18, %v42_v17  ;;  %v75_v21 = vld [vmem:[%s1692_s0 + $0x18] sm:$0xff]  ;;  %v44_v22 = vld [vmem:[#allocation4 + $0x30] sm:$0xff]  ;;  %v76_v24 = vld [vmem:[%s1692_s0 + $0x20] sm:$0xff] }
  0x1a   :  { %1262 = vmatprep.subr.bf16.mxu0 %v1422_v0  ;;  %v45_v23 = vld [vmem:[#allocation4 + $0x38] sm:$0xff]  ;;  %v77_v26 = vld [vmem:[%s1692_s0 + $0x28] sm:$0xff]  ;;  %v78_v28 = vld [vmem:[%s1692_s0 + $0x30] sm:$0xff] }
  0x1b   :  { %v1532_v25 = vpack.c.bf16 %v45_v23, %v44_v22  ;;  %v79_v29 = vld [vmem:[%s1692_s0 + $0x38] sm:$0xff]  ;;  %v50_v62 = vld [vmem:[%s1696_s4] sm:$0xff]  ;;  %v51_v63 = vld [vmem:[%s1696_s4 + $0x8] sm:$0xff] }
  0x1c   :  { %1246 = vmatpush3.bf16.msk.msra.mxu1 %vm1242_vm4, %v1241_v8  ;;  %v53_v7 = vld [vmem:[%s1696_s4 + $0x18] sm:$0xff]  ;;  %v55_v12 = vld [vmem:[%s1696_s4 + $0x28] sm:$0xff] }
  0x1d   :  { %1247 = vmatprep.subr.bf16.mxu1 %v1422_v0  ;;  %1264 = vmatpush3.bf16.msra.mxu0 %v1505_v15 }
  0x1e   :  { %1265 = vmatprep.subr.bf16.mxu0 %v1422_v0 }
  0x1f   :  { %1065 = vmatmul.mubr.msk.f32.vlgmr.msra.gmra.mrb[0].mxu1 %vm80_vm2, %v73_v16  ;;  %v57_v16 = vld [vmem:[%s1696_s4 + $0x38] sm:$0xff] }
  0x20   :  { %1249 = vmatpush3.bf16.msra.mxu1 %v1496_v11  ;;  %1067 = vmatprep.mubr.msk.f32.mxu1 %vm80_vm2, %v74_v19 }
  0x21   :  { %1250 = vmatprep.subr.bf16.mxu1 %v1422_v0  ;;  %1267 = vmatpush3.bf16.msra.mxu0 %v1518_v20 }
  0x22   :  { %1268 = vmatprep.subr.bf16.mxu0 %v1422_v0  ;;  %v1356_v27 = vpop.eup %1355 }
  0x23   :  { %1068 = vmatmul.mubr.msk.f32.gmra.mrb[2].mxu1 %vm80_vm2, %v75_v21  ;;  %224 = vst.msk [vmem:[#allocation3] sm:$0xff] %vm214_vm5, %v1356_v27 }
  0x24   :  { %1252 = vmatpush3.bf16.msra.mxu1 %v1505_v15  ;;  %1070 = vmatprep.mubr.msk.f32.mxu1 %vm80_vm2, %v76_v24 }
  0x25   :  { %1253 = vmatprep.subr.bf16.mxu1 %v1422_v0  ;;  %1270 = vmatpush3.bf16.msra.mxu0 %v1532_v25 }
  0x26   :  { %1283 = vmatprep.subr.bf16.mxu0 %v1422_v0 }
  0x27   :  { %1071 = vmatmul.mubr.msk.f32.gmra.mrb[4].mxu1 %vm80_vm2, %v77_v26 }
  0x28   :  { %1255 = vmatpush3.bf16.msra.mxu1 %v1518_v20  ;;  %1073 = vmatprep.mubr.msk.f32.mxu1 %vm80_vm2, %v78_v28  ;;  %v940_v28 = vld [vmem:[%s1697_s5] ss:$0 sm:$0xff]  ;;  %s1426_s5 = smov [#allocation7]  }
  0x29   :  { %1256 = vmatprep.subr.bf16.mxu1 %v1422_v0  ;;  %s927_s25 = sshll.u32 %s1426_s5, 4  ;;  %s928_s25 = int_to_ptr.vmem [resolvable:$true] %s927_s25 }
  0x2a   :  { %v777_v9 = vld [vmem:[#allocation3] sm:$0xff]  ;;  %s1393_s26 = scalar_lea.vmem %s928_s25, 1024  ;;  %p1398_p9 = scmp.lt.s32.totalorder %s928_s25, %s928_s25 }
  0x2b   :  { %1074 = vmatmul.mubr.msk.f32.gmra.mrb[6].mxu1 %vm80_vm2, %v79_v29  ;;  %p1394_p8 = scmp.ne.s32.totalorder %s928_s25, %s1393_s26  ;;  %p1399_p10 = scmp.lt.s32.totalorder %s1393_s26, %s1393_s26 }
  0x2c   :  { %1258 = vmatpush3.bf16.msra.mxu1 %v1532_v25  ;;  %1092 = vmatprep.mubr.msk.f32.mxu1 %vm1423_vm0, %v1424_v1 }
  0x2d   :  { %1271 = vmatprep.subr.bf16.mxu1 %v1422_v0  ;;  %p1400_p11 = por %p1399_p10, %p1398_p9 }
  0x2f   :  { %1093 = vmatmul.mubr.msk.f32.vlgmr.msra.gmra.mrb[8].mxu1 %vm214_vm5, %v1356_v27  ;;  %p1401_p12 = pnand %p1400_p11, %p1394_p8 }
  0x30   :  { %1273 = vmatpush3.bf16.msra.mxu1 %v1496_v11  ;;  %1130 = vmatprep.mubr.msk.f32.mxu1 %vm1423_vm0, %v1424_v1 }
  0x31   :  { %1274 = vmatprep.subr.bf16.mxu1 %v1422_v0 }
  0x34   :  { %1276 = vmatpush3.bf16.msra.mxu1 %v1505_v15 }
  0x35   :  { %1277 = vmatprep.subr.bf16.mxu1 %v1422_v0 }
  0x38   :  { %1279 = vmatpush3.bf16.msra.mxu1 %v1518_v20 }
  0x39   :  { %1280 = vmatprep.subr.bf16.mxu1 %v1422_v0 }
  0x3c   :  { %1282 = vmatpush3.bf16.msra.mxu1 %v1532_v25 }
  0x3d   :  { %1295 = vmatprep.subr.bf16.mxu1 %v1422_v0 }
  0xf2   :  { %v1066_v30 = vpop.f32.mrb[0].mxu1 }
  0xf3   :  { %216 = vst.msk [vmem:[#allocation2 + $0x8] sm:$0xff] %vm214_vm5, %v1066_v30  ;;  %v175_v31 = vpop.f32.mrb[1].mxu1 }
  0xf4   :  { %215 = vst.msk [vmem:[#allocation2] sm:$0xff] %vm214_vm5, %v175_v31 }
  0xf6   :  { %v1069_v32 = vpop.f32.mrb[2].mxu1 }
  0xf7   :  { %218 = vst.msk [vmem:[#allocation2 + $0x18] sm:$0xff] %vm214_vm5, %v1069_v32  ;;  %v185_v33 = vpop.f32.mrb[3].mxu1 }
  0xf8   :  { %217 = vst.msk [vmem:[#allocation2 + $0x10] sm:$0xff] %vm214_vm5, %v185_v33 }
  0xfa   :  { %v1072_v34 = vpop.f32.mrb[4].mxu1  ;;  %v304_v44 = vld [vmem:[#allocation2 + $0x8] sm:$0xff] }
  0xfb   :  { %220 = vst.msk [vmem:[#allocation2 + $0x28] sm:$0xff] %vm214_vm5, %v1072_v34  ;;  %v195_v35 = vpop.f32.mrb[5].mxu1  ;;  %v225_v38 = vld [vmem:[#allocation2] sm:$0xff] }
  0xfc   :  { %219 = vst.msk [vmem:[#allocation2 + $0x20] sm:$0xff] %vm214_vm5, %v195_v35 }
  0xfe   :  { %v1075_v36 = vpop.f32.mrb[6].mxu1  ;;  %v462_v56 = vld [vmem:[#allocation2 + $0x18] sm:$0xff] }
  0xff   :  { %v205_v37 = vpop.f32.mrb[7].mxu1  ;;  %v383_v50 = vld [vmem:[#allocation2 + $0x10] sm:$0xff] }
 0x100   :  { %221 = vst.msk [vmem:[#allocation2 + $0x30] sm:$0xff] %vm214_vm5, %v205_v37 }
 0x102   :  { %v295_v39 = vpop.f32.mrb[8].mxu1  ;;  %v620_v23 = vld [vmem:[#allocation2 + $0x28] sm:$0xff] }
 0x103   :  { %v296_v40 = vadd.f32 %v295_v39, %v225_v38  ;;  %v1094_v41 = vpop.f32.mrb[9].mxu1  ;;  %v541_v2 = vld [vmem:[#allocation2 + $0x20] sm:$0xff] }
 0x105   :  { %v299_v42 = vadd.f32 %v1502_v14, %v296_v40 }
 0x107   :  { %1357 = vtanh.f32 %v299_v42 }
 0x111   :  { %v1358_v43 = vpop.eup %1357 }
 0x112   :  { %302 = vst.msk [vmem:[#allocation3 + $0x8] sm:$0xff] %vm214_vm5, %v1358_v43  ;;  %1112 = vmatmul.mubr.msk.f32.vlgmr.msra.gmra.mrb[0].mxu0 %vm214_vm5, %v1358_v43  ;;  %v699_v43 = vld [vmem:[#allocation2 + $0x30] sm:$0xff] }
 0x113   :  { %1285 = vmatpush3.bf16.msra.mxu0 %v1496_v11  ;;  %1149 = vmatprep.mubr.msk.f32.mxu0 %vm1423_vm0, %v1424_v1 }
 0x114   :  { %1286 = vmatprep.subr.bf16.mxu0 %v1422_v0 }
 0x117   :  { %1288 = vmatpush3.bf16.msra.mxu0 %v1505_v15 }
 0x118   :  { %1289 = vmatprep.subr.bf16.mxu0 %v1422_v0 }
 0x119   :  { %v778_v18 = vld [vmem:[#allocation3 + $0x8] sm:$0xff] }
 0x11b   :  { %1291 = vmatpush3.bf16.msra.mxu0 %v1518_v20 }
 0x11c   :  { %1292 = vmatprep.subr.bf16.mxu0 %v1422_v0 }
 0x11f   :  { %1294 = vmatpush3.bf16.msra.mxu0 %v1532_v25 }
 0x120   :  { %1307 = vmatprep.subr.bf16.mxu0 %v1422_v0 }
 0x1e5   :  { %v374_v45 = vpop.f32.mrb[0].mxu0 }
 0x1e6   :  { %v375_v46 = vadd.f32 %v374_v45, %v304_v44  ;;  %v1113_v47 = vpop.f32.mrb[1].mxu0 }
 0x1e8   :  { %v378_v48 = vadd.f32 %v1502_v14, %v375_v46 }
 0x1ea   :  { %1359 = vtanh.f32 %v378_v48 }
 0x1f4   :  { %v1360_v49 = vpop.eup %1359 }
 0x1f5   :  { %381 = vst.msk [vmem:[#allocation3 + $0x10] sm:$0xff] %vm214_vm5, %v1360_v49  ;;  %1131 = vmatmul.mubr.msk.f32.vlgmr.msra.gmra.mrb[10].mxu1 %vm214_vm5, %v1360_v49 }
 0x1f6   :  { %1297 = vmatpush3.bf16.msra.mxu1 %v1496_v11  ;;  %1168 = vmatprep.mubr.msk.f32.mxu1 %vm1423_vm0, %v1424_v1 }
 0x1f7   :  { %1298 = vmatprep.subr.bf16.mxu1 %v1422_v0 }
 0x1fa   :  { %1300 = vmatpush3.bf16.msra.mxu1 %v1505_v15 }
 0x1fb   :  { %1301 = vmatprep.subr.bf16.mxu1 %v1422_v0 }
 0x1fc   :  { %v779_v19 = vld [vmem:[#allocation3 + $0x10] sm:$0xff] }
 0x1fe   :  { %1303 = vmatpush3.bf16.msra.mxu1 %v1518_v20 }
 0x1ff   :  { %1304 = vmatprep.subr.bf16.mxu1 %v1422_v0 }
 0x202   :  { %1306 = vmatpush3.bf16.msra.mxu1 %v1532_v25 }
 0x203   :  { %1319 = vmatprep.subr.bf16.mxu1 %v1422_v0 }
 0x2c8   :  { %v453_v51 = vpop.f32.mrb[10].mxu1 }
 0x2c9   :  { %v454_v52 = vadd.f32 %v453_v51, %v383_v50  ;;  %v1132_v53 = vpop.f32.mrb[11].mxu1 }
 0x2cb   :  { %v457_v54 = vadd.f32 %v1502_v14, %v454_v52 }
 0x2cd   :  { %1361 = vtanh.f32 %v457_v54 }
 0x2d7   :  { %v1362_v55 = vpop.eup %1361 }
 0x2d8   :  { %460 = vst.msk [vmem:[#allocation3 + $0x18] sm:$0xff] %vm214_vm5, %v1362_v55  ;;  %1150 = vmatmul.mubr.msk.f32.vlgmr.msra.gmra.mrb[2].mxu0 %vm214_vm5, %v1362_v55 }
 0x2d9   :  { %1309 = vmatpush3.bf16.msra.mxu0 %v1496_v11  ;;  %1187 = vmatprep.mubr.msk.f32.mxu0 %vm1423_vm0, %v1424_v1 }
 0x2da   :  { %1310 = vmatprep.subr.bf16.mxu0 %v1422_v0 }
 0x2dd   :  { %1312 = vmatpush3.bf16.msra.mxu0 %v1505_v15 }
 0x2de   :  { %1313 = vmatprep.subr.bf16.mxu0 %v1422_v0 }
 0x2e1   :  { %1315 = vmatpush3.bf16.msra.mxu0 %v1518_v20 }
 0x2e2   :  { %1316 = vmatprep.subr.bf16.mxu0 %v1422_v0 }
 0x2e5   :  { %1318 = vmatpush3.bf16.msra.mxu0 %v1532_v25 }
 0x3ab   :  { %v532_v57 = vpop.f32.mrb[2].mxu0 }
 0x3ac   :  { %v533_v58 = vadd.f32 %v532_v57, %v462_v56  ;;  %v1151_v59 = vpop.f32.mrb[3].mxu0 }
 0x3ae   :  { %v536_v60 = vadd.f32 %v1502_v14, %v533_v58 }
 0x3b0   :  { %1363 = vtanh.f32 %v536_v60 }
 0x3ba   :  { %v1364_v61 = vpop.eup %1363 }
 0x3bb   :  { %539 = vst.msk [vmem:[#allocation3 + $0x20] sm:$0xff] %vm214_vm5, %v1364_v61  ;;  %1169 = vmatmul.mubr.msk.f32.vlgmr.msra.gmra.mrb[12].mxu1 %vm214_vm5, %v1364_v61 }
 0x3bc   :  { %1321 = vmatpush3.bf16.msra.mxu1 %v1496_v11  ;;  %1206 = vmatprep.mubr.msk.f32.mxu1 %vm1423_vm0, %v1424_v1  ;;  %v1331_v1 = vpack.c.bf16 %v51_v63, %v50_v62  ;;  %v54_v11 = vld [vmem:[%s1696_s4 + $0x20] sm:$0xff] }
 0x3bd   :  { %1322 = vmatprep.subr.bf16.mxu1 %v1422_v0  ;;  %v1339_v13 = vpack.c.bf16 %v55_v12, %v54_v11 }
 0x3be   :  { %1332 = vmatprep.subr.bf16.mxu0 %v1331_v1 }
 0x3c0   :  { %1324 = vmatpush3.bf16.msra.mxu1 %v1505_v15  ;;  %v56_v15 = vld [vmem:[%s1696_s4 + $0x30] sm:$0xff] }
 0x3c1   :  { %1325 = vmatprep.subr.bf16.mxu1 %v1422_v0  ;;  %v1343_v17 = vpack.c.bf16 %v57_v16, %v56_v15 }
 0x3c2   :  { %v781_v21 = vld [vmem:[#allocation3 + $0x20] sm:$0xff] }
 0x3c4   :  { %1327 = vmatpush3.bf16.msra.mxu1 %v1518_v20  ;;  %v780_v20 = vld [vmem:[#allocation3 + $0x18] sm:$0xff] }
 0x3c5   :  { %1328 = vmatprep.subr.bf16.mxu1 %v1422_v0  ;;  %v52_v0 = vld [vmem:[%s1696_s4 + $0x10] sm:$0xff] }
 0x3c6   :  { %v1335_v8 = vpack.c.bf16 %v53_v7, %v52_v0 }
 0x3c8   :  { %1330 = vmatpush3.bf16.msra.mxu1 %v1532_v25 }
 0x48e   :  { %v611_v3 = vpop.f32.mrb[12].mxu1 }
 0x48f   :  { %v612_v4 = vadd.f32 %v611_v3, %v541_v2  ;;  %v1170_v5 = vpop.f32.mrb[13].mxu1 }
 0x491   :  { %v615_v6 = vadd.f32 %v1502_v14, %v612_v4 }
 0x493   :  { %1365 = vtanh.f32 %v615_v6 }
 0x49d   :  { %v1366_v10 = vpop.eup %1365 }
 0x49e   :  { %618 = vst.msk [vmem:[#allocation3 + $0x28] sm:$0xff] %vm214_vm5, %v1366_v10  ;;  %1188 = vmatmul.mubr.msk.f32.vlgmr.msra.gmra.mrb[4].mxu0 %vm214_vm5, %v1366_v10 }
 0x49f   :  { %1334 = vmatpush3.bf16.msra.mxu0 %v1331_v1  ;;  %1225 = vmatprep.mubr.msk.f32.mxu0 %vm214_vm5, %v777_v9 }
 0x4a0   :  { %1336 = vmatprep.subr.bf16.mxu0 %v1335_v8 }
 0x4a3   :  { %1338 = vmatpush3.bf16.msra.mxu0 %v1335_v8 }
 0x4a4   :  { %1340 = vmatprep.subr.bf16.mxu0 %v1339_v13 }
 0x4a5   :  { %v782_v22 = vld [vmem:[#allocation3 + $0x28] sm:$0xff] }
 0x4a7   :  { %1342 = vmatpush3.bf16.msra.mxu0 %v1339_v13 }
 0x4a8   :  { %1344 = vmatprep.subr.bf16.mxu0 %v1343_v17 }
 0x4ab   :  { %1346 = vmatpush3.bf16.msra.mxu0 %v1343_v17 }
 0x4ae   :  { %1226 = vmatmul.mubr.msk.f32.vlgmr.msra.gmra.mrb[6].mxu0 %vm214_vm5, %v778_v18 }
 0x4af   :  { %1228 = vmatprep.mubr.msk.f32.mxu0 %vm214_vm5, %v779_v19 }
 0x4b2   :  { %1229 = vmatmul.mubr.msk.f32.gmra.mrb[8].mxu0 %vm214_vm5, %v780_v20 }
 0x4b3   :  { %1231 = vmatprep.mubr.msk.f32.mxu0 %vm214_vm5, %v781_v21 }
 0x4b6   :  { %1232 = vmatmul.mubr.msk.f32.gmra.mrb[10].mxu0 %vm214_vm5, %v782_v22 }
 0x571   :  { %v690_v24 = vpop.f32.mrb[4].mxu0 }
 0x572   :  { %v691_v25 = vadd.f32 %v690_v24, %v620_v23  ;;  %v1189_v26 = vpop.f32.mrb[5].mxu0 }
 0x574   :  { %v694_v27 = vadd.f32 %v1502_v14, %v691_v25 }
 0x576   :  { %1367 = vtanh.f32 %v694_v27 }
 0x580   :  { %v1368_v29 = vpop.eup %1367 }
 0x581   :  { %697 = vst.msk [vmem:[#allocation3 + $0x30] sm:$0xff] %vm214_vm5, %v1368_v29  ;;  %v1227_v30 = vpop.f32.mrb[6].mxu0  ;;  %1207 = vmatmul.mubr.msk.f32.vlgmr.msra.gmra.mrb[14].mxu1 %vm214_vm5, %v1368_v29 }
 0x582   :  { %v881_v31 = vadd.f32 %v1227_v30, %v940_v28  ;;  %v875_v32 = vpop.f32.mrb[7].mxu0 }
 0x583   :  { %v876_v33 = vadd.f32 %v940_v28, %v875_v32 }
 0x584   :  { %915 = vst.msk [vmem:[#allocation7 + $0x8] sm:$0xff] %vm80_vm2, %v881_v31 }
 0x585   :  { %914 = vst.msk [vmem:[#allocation7] sm:$0xff] %vm80_vm2, %v876_v33  ;;  %v1230_v34 = vpop.f32.mrb[8].mxu0 }
 0x586   :  { %v891_v35 = vadd.f32 %v1230_v34, %v940_v28  ;;  %v885_v36 = vpop.f32.mrb[9].mxu0 }
 0x587   :  { %v886_v37 = vadd.f32 %v940_v28, %v885_v36 }
 0x588   :  { %917 = vst.msk [vmem:[#allocation7 + $0x18] sm:$0xff] %vm80_vm2, %v891_v35  ;;  %v783_v38 = vld [vmem:[#allocation3 + $0x30] sm:$0xff] }
 0x589   :  { %916 = vst.msk [vmem:[#allocation7 + $0x10] sm:$0xff] %vm80_vm2, %v886_v37  ;;  %v1233_v39 = vpop.f32.mrb[10].mxu0  ;;  %1234 = vmatprep.mubr.msk.f32.mxu0 %vm214_vm5, %v783_v38 }
 0x58a   :  { %v901_v40 = vadd.f32 %v1233_v39, %v940_v28  ;;  %v895_v41 = vpop.f32.mrb[11].mxu0 }
 0x58b   :  { %v896_v42 = vadd.f32 %v940_v28, %v895_v41 }
 0x58c   :  { %919 = vst.msk [vmem:[#allocation7 + $0x28] sm:$0xff] %vm80_vm2, %v901_v40 }
 0x58d   :  { %918 = vst.msk [vmem:[#allocation7 + $0x20] sm:$0xff] %vm80_vm2, %v896_v42 }
 0x654   :  { %v769_v44 = vpop.f32.mrb[14].mxu1 }
 0x655   :  { %v770_v45 = vadd.f32 %v769_v44, %v699_v43  ;;  %v1208_v46 = vpop.f32.mrb[15].mxu1 }
 0x657   :  { %v773_v47 = vadd.f32 %v1502_v14, %v770_v45 }
 0x659   :  { %1369 = vtanh.f32 %v773_v47 }
 0x663   :  { %v1370_v48 = vpop.eup %1369 }
 0x664   :  { %776 = vst.msk [vmem:[#allocation3 + $0x38] sm:$0xff] %vm214_vm5, %v1370_v48 }
 0x66b   :  { %v784_v49 = vld [vmem:[#allocation3 + $0x38] sm:$0xff] }
 0x66c   :  { %1235 = vmatmul.mubr.msk.f32.gmra.mrb[12].mxu0 %vm214_vm5, %v784_v49 }
 0x73f   :  { %v1236_v50 = vpop.f32.mrb[12].mxu0 }
 0x740   :  { %v911_v51 = vadd.f32 %v1236_v50, %v940_v28  ;;  %v905_v52 = vpop.f32.mrb[13].mxu0 }
 0x741   :  { %v906_v53 = vadd.f32 %v940_v28, %v905_v52 }
 0x742   :  { %921 = vst.msk [vmem:[#allocation7 + $0x38] sm:$0xff] %vm80_vm2, %v911_v51 }
 0x743   :  { %920 = vst.msk [vmem:[#allocation7 + $0x30] sm:$0xff] %vm80_vm2, %v906_v53 }
 0x744   :  { %1404 = shalt.err (!%p1401_p12)
}
 0x745   :  { %s1405_s29 = scalar_lea.hbm %s1698_s6, 1024 }
 0x746   :  { %p1406_p13 = scmp.ne.s32.totalorder %s1698_s6, %s1405_s29  ;;  %p1409_p0 = scmp.lt.u32.totalorder %s1405_s29, %s1698_s6 }
 0x748   :  { %p1411_p1 = pnand %p1409_p0, %p1406_p13 }
 0x74a   :  { %1414 = shalt.err (!%p1411_p1)
}
 0x74b   :  { %933 = dma.vmem_to_hbm [thread:$0]  %s928_s25, 1024, %s1698_s6, [#allocation6], %s1420_s7, %s1420_s7, %s1421_s8  }
 0x74c   :  { %1417 = dma.done.wait [#allocation6], 1024  }
 0x74d   :  { %1418 = vsyncadd [#allocation6], 4294966272 }
 0x74e   :  { %937 = vsyncpa [#allocation5], 1 }
 0x74f   :  { %938 = vsyncpa [#allocation6], 1 }

</bundles_post_ra>
